<compile_context>
chip_gen: v7x
topology: tpu7x:2x2x1
jax: 0.10.0
libtpu: 0.0.40
codegen_flags: <defaults>
</compile_context>

<pallas_src>
import functools

import jax
import jax.numpy as jnp
from jax.experimental import pallas as pl
from jax.experimental.pallas import tpu as pltpu


def _round_up(x, m):
    return ((x + m - 1) // m) * m


# ---------------------------------------------------------------------------
# Pallas kernels
# ---------------------------------------------------------------------------
def _gemm_bias_kernel(x_ref, w_ref, b_ref, o_ref, *, relu):
    """(TM, K) @ (K, Np) single-shot GEMM with f32 epilogue (bias, optional ReLU)."""
    acc = jnp.dot(x_ref[...], w_ref[...], preferred_element_type=jnp.float32)
    y = acc + b_ref[...]                       # epilogue in f32
    if relu:
        y = jnp.maximum(y, 0.0)
    o_ref[...] = y.astype(o_ref.dtype)


def matmul_bias(x, w, b, *, relu, out_dtype=jnp.bfloat16):
    """(M, K) @ (K, N) + b with optional fused ReLU.  bf16 MXU inputs, f32 accum.

    K is a single full-extent block (no K padding, no pad HBM copy, weights stay
    VMEM resident).  N is zero-padded up to a multiple of 128 so epilogue stores
    are lane-dense; the caller gets the [:M, :N] slice back.
    """
    M, K = x.shape
    K2, N = w.shape
    assert K == K2

    Np = max(128, _round_up(N, 128))                   # lane-dense output
    TM = 512 if M >= 512 else _round_up(M, 16)         # 16-aligned bf16 rows
    Mp = _round_up(M, TM)

    x_p = x.astype(jnp.bfloat16)
    if Mp != M:
        # Padded rows produce relu(bias) garbage; they are sliced off below and
        # must never be consumed directly.
        x_p = jnp.pad(x_p, ((0, Mp - M), (0, 0)))
    w_p = w.astype(jnp.bfloat16)
    b_p = b.astype(jnp.float32).reshape(1, N)
    if Np != N:
        w_p = jnp.pad(w_p, ((0, 0), (0, Np - N)))
        b_p = jnp.pad(b_p, ((0, 0), (0, Np - N)))

    cost = pl.CostEstimate(
        flops=2 * Mp * K * Np,
        transcendentals=0,
        bytes_accessed=Mp * K * 2 + K * Np * 2 + Np * 4
        + Mp * Np * jnp.dtype(out_dtype).itemsize,
    )
    out = pl.pallas_call(
        functools.partial(_gemm_bias_kernel, relu=relu),
        grid=(Mp // TM,),                                          # no size-1 axes
        in_specs=[
            pl.BlockSpec((TM, K), lambda i: (i, 0)),               # K full extent
            pl.BlockSpec((K, Np), lambda i: (0, 0)),               # VMEM-resident W
            pl.BlockSpec((1, Np), lambda i: (0, 0)),
        ],
        out_specs=pl.BlockSpec((TM, Np), lambda i: (i, 0)),
        out_shape=jax.ShapeDtypeStruct((Mp, Np), out_dtype),
        compiler_params=pltpu.CompilerParams(
            dimension_semantics=("parallel",),
            vmem_limit_bytes=32 * 1024 * 1024,
        ),
        cost_estimate=cost,
    )(x_p, w_p, b_p)
    return out[:M, :N]


def _conv_pool_kernel(x_ref, w_ref, b_ref, o_ref, *, inv_s, s_valid, ts):
    """conv3 GEMM (+bias, ReLU) fused with the spatial mean.

    Grid = (B, S_tiles); the S axis is the trailing "arbitrary" reduction axis
    and partial post-ReLU sums accumulate into the f32 output block.
    """
    s = pl.program_id(1)

    @pl.when(s == 0)
    def _():
        o_ref[...] = jnp.zeros_like(o_ref)

    acc = jnp.dot(x_ref[0], w_ref[...], preferred_element_type=jnp.float32)
    y = jnp.maximum(acc + b_ref[...], 0.0)                    # (TS, N) f32
    if s_valid is not None:
        # Mask zero-padded spatial rows (their relu(bias) must not pollute the mean).
        row = jax.lax.broadcasted_iota(jnp.int32, (ts, 1), 0) + s * ts
        y = jnp.where(row < s_valid, y, 0.0)
    part = jnp.sum(y, axis=0, keepdims=True) * inv_s          # (1, N) f32
    o_ref[...] += part[None]


def conv_pool_fused(patches_bsk, w, b):
    """patches: (B, S, K);  w: (K, N);  returns relu(conv).mean(spatial) -> (B, N)."""
    B, S, K = patches_bsk.shape
    N = w.shape[1]

    TS = S if S <= 512 else 512               # cap per-step VMEM (v7x 64 MiB phys)
    Sp = _round_up(S, TS)
    x = patches_bsk.astype(jnp.bfloat16)
    if Sp != S:
        x = jnp.pad(x, ((0, 0), (0, Sp - S), (0, 0)))

    cost = pl.CostEstimate(
        flops=2 * B * Sp * K * N,
        transcendentals=0,
        bytes_accessed=B * Sp * K * 2 + K * N * 2 + N * 4 + B * N * 4,
    )
    out = pl.pallas_call(
        functools.partial(_conv_pool_kernel, inv_s=1.0 / S,
                          s_valid=(S if Sp != S else None), ts=TS),
        grid=(B, Sp // TS),
        in_specs=[
            pl.BlockSpec((1, TS, K), lambda bb, ss: (bb, ss, 0)),  # K full extent
            pl.BlockSpec((K, N), lambda bb, ss: (0, 0)),           # VMEM-resident W
            pl.BlockSpec((1, N), lambda bb, ss: (0, 0)),
        ],
        out_specs=pl.BlockSpec((1, 1, N), lambda bb, ss: (bb, 0, 0)),
        out_shape=jax.ShapeDtypeStruct((B, 1, N), jnp.float32),
        compiler_params=pltpu.CompilerParams(
            dimension_semantics=("parallel", "arbitrary"),
            vmem_limit_bytes=32 * 1024 * 1024,
        ),
        cost_estimate=cost,
    )(x, w.astype(jnp.bfloat16), b.reshape(1, N).astype(jnp.float32))
    return out[:, 0, :]


# ---------------------------------------------------------------------------
# Conv glue (im2col in plain JAX, GEMM in Pallas)
# ---------------------------------------------------------------------------
def _im2col(x, kh, kw, stride, pad):
    # x: (N, H, W, C)
    N, H, W, C = x.shape
    xp = jnp.pad(x, ((0, 0), (pad, pad), (pad, pad), (0, 0)))
    OH = (H + 2 * pad - kh) // stride + 1
    OW = (W + 2 * pad - kw) // stride + 1
    cols = []
    for i in range(kh):
        for j in range(kw):
            cols.append(xp[:, i:i + (OH - 1) * stride + 1:stride,
                           j:j + (OW - 1) * stride + 1:stride, :])
    patches = jnp.stack(cols, axis=3)            # (N, OH, OW, KH*KW, C)
    return patches.reshape(N, OH, OW, kh * kw * C), OH, OW


def _weight_to_matmul(w_pt):
    # PyTorch (Cout, Cin, KH, KW) -> (KH*KW*Cin, Cout), matching im2col K order.
    Cout, Cin, KH, KW = w_pt.shape
    return jnp.transpose(w_pt, (2, 3, 1, 0)).reshape(KH * KW * Cin, Cout)


def conv2d_gemm(x, w_pt, b, *, stride, pad, relu, out_dtype=jnp.bfloat16):
    Cout, Cin, KH, KW = w_pt.shape
    patches, OH, OW = _im2col(x.astype(jnp.bfloat16), KH, KW, stride, pad)
    B = x.shape[0]
    K = KH * KW * Cin
    y = matmul_bias(patches.reshape(B * OH * OW, K), _weight_to_matmul(w_pt), b,
                    relu=relu, out_dtype=out_dtype)
    return y.reshape(B, OH, OW, Cout)


def conv1_xla(x_nhwc, w_pt, b):
    # conv1 has K=100, N=32: a Pallas GEMM launch + pad + masked stores costs more
    # than the compute (perf review), so it stays on the XLA conv path in f32.
    y = jax.lax.conv_general_dilated(
        x_nhwc.astype(jnp.float32), jnp.transpose(w_pt, (2, 3, 1, 0)),
        window_strides=(2, 2), padding=((2, 2), (2, 2)),
        dimension_numbers=('NHWC', 'HWIO', 'NHWC'),
        preferred_element_type=jnp.float32)
    return jnp.maximum(y + b, 0.0)


# ---------------------------------------------------------------------------
# Parameters (deterministic, synthetic; PyTorch-default-style init)
# ---------------------------------------------------------------------------
def _conv_init(key, cout, cin, kh, kw):
    fan_in = cin * kh * kw
    bound = 1.0 / (fan_in ** 0.5)
    kw_, kb_ = jax.random.split(key)
    w = jax.random.uniform(kw_, (cout, cin, kh, kw), jnp.float32, -bound, bound)
    b = jax.random.uniform(kb_, (cout,), jnp.float32, -bound, bound)
    return w, b


def _fold_bn(w, b, c, eps=1e-5):
    # eval-mode BN with default stats: gamma=1, beta=0, running_mean=0, running_var=1
    gamma = jnp.ones((c,), jnp.float32)
    beta = jnp.zeros((c,), jnp.float32)
    mean = jnp.zeros((c,), jnp.float32)
    var = jnp.ones((c,), jnp.float32)
    scale = gamma / jnp.sqrt(var + eps)
    return w * scale[:, None, None, None], (b - mean) * scale + beta


def init_params(key):
    ks = jax.random.split(key, 3)
    p = {}
    p['conv1_w'], p['conv1_b'] = _conv_init(ks[0], 32, 4, 5, 5)
    w, b = _conv_init(ks[1], 64, 32, 5, 5)
    p['conv2_w'], p['conv2_b'] = _fold_bn(w, b, 64)       # bn2 folded
    w, b = _conv_init(ks[2], 128, 64, 5, 5)
    p['conv3_w'], p['conv3_b'] = _fold_bn(w, b, 128)      # bn3 folded
    return p


# ---------------------------------------------------------------------------
# Forward pass
# ---------------------------------------------------------------------------
def conv3block_forward(x_nchw, p):
    """x: (B, 4, H, W) -> (B, 128) == relu chain of 3 strided convs + spatial mean."""
    x = jnp.transpose(x_nchw, (0, 2, 3, 1))                           # NHWC
    h = conv1_xla(x, p['conv1_w'], p['conv1_b']).astype(jnp.bfloat16)
    h = conv2d_gemm(h, p['conv2_w'], p['conv2_b'], stride=2, pad=2, relu=True)
    # conv3 + folded bn3 + ReLU + spatial mean fused into one Pallas kernel.
    Cout, Cin, KH, KW = p['conv3_w'].shape
    patches, OH, OW = _im2col(h, KH, KW, 2, 2)
    B = h.shape[0]
    K = KH * KW * Cin
    return conv_pool_fused(patches.reshape(B, OH * OW, K),
                           _weight_to_matmul(p['conv3_w']), p['conv3_b'])


# ---------------------------------------------------------------------------
# Pure-JAX reference (same folded params) for a self-consistency check
# ---------------------------------------------------------------------------
def reference_forward(x_nchw, p):
    x = jnp.transpose(x_nchw, (0, 2, 3, 1)).astype(jnp.float32)

    def conv(h, w, b, relu):
        y = jax.lax.conv_general_dilated(
            h, jnp.transpose(w, (2, 3, 1, 0)), (2, 2), ((2, 2), (2, 2)),
            dimension_numbers=('NHWC', 'HWIO', 'NHWC'),
            preferred_element_type=jnp.float32)
        y = y + b
        return jnp.maximum(y, 0.0) if relu else y

    h = conv(x, p['conv1_w'], p['conv1_b'], True)
    h = conv(h, p['conv2_w'], p['conv2_b'], True)
    h = conv(h, p['conv3_w'], p['conv3_b'], True)
    return jnp.mean(h, axis=(1, 2))


if __name__ == "__main__":
    key = jax.random.PRNGKey(0)
    kx, kp = jax.random.split(key)

    B, C, Himg, Wimg = 2, 4, 16, 16
    x = jax.random.normal(kx, (B, C, Himg, Wimg), jnp.float32)
    params = init_params(kp)

    y = jax.jit(conv3block_forward)(x, params)
    jax.block_until_ready(y)

    assert y.shape == (B, 128), y.shape
    assert bool(jnp.all(jnp.isfinite(y)))

    # Loose check vs an f32 reference (Pallas path uses bf16 patches/weights).
    y_ref = reference_forward(x, params)
    err = float(jnp.max(jnp.abs(y.astype(jnp.float32) - y_ref)))
    scale = float(jnp.max(jnp.abs(y_ref))) + 1e-6
    assert err <= 0.05 * scale + 0.02, (err, scale)

    print("KERNEL_OK")
</pallas_src>

<mosaic_0001>
module attributes {stable_mosaic.version = 11 : i64} {
  func.func @_gemm_bias_kernel(%arg0: i32, %arg1: memref<32x800xbf16, #tpu.memory_space<vmem>>, %arg2: memref<800x128xbf16, #tpu.memory_space<vmem>>, %arg3: memref<1x128xf32, #tpu.memory_space<vmem>>, %arg4: memref<32x128xbf16, #tpu.memory_space<vmem>>) attributes {dimension_semantics = [#tpu.dimension_semantics<parallel>], iteration_bounds = array<i64: 1>, scalar_prefetch = 0 : i64, scratch_operands = 0 : i64, tpu.core_type = #tpu.core_type<tc>, window_params = [{transform_indices = @transform_0, window_bounds = array<i64: 32, 800>}, {pipeline_mode = #tpu.pipeline_mode<synchronous>, transform_indices = @transform_1, window_bounds = array<i64: 800, 128>}, {pipeline_mode = #tpu.pipeline_mode<synchronous>, transform_indices = @transform_2, window_bounds = array<i64: 1, 128>}, {transform_indices = @transform_3, window_bounds = array<i64: 32, 128>}]} {
    %c0 = arith.constant 0 : index
    %c0_0 = arith.constant 0 : index
    %0 = vector.load %arg1[%c0, %c0_0] : memref<32x800xbf16, #tpu.memory_space<vmem>>, vector<32x800xbf16>
    %c0_1 = arith.constant 0 : index
    %c0_2 = arith.constant 0 : index
    %1 = vector.load %arg2[%c0_1, %c0_2] : memref<800x128xbf16, #tpu.memory_space<vmem>>, vector<800x128xbf16>
    %cst = arith.constant dense<0.000000e+00> : vector<32x128xf32>
    %2 = tpu.matmul %0, %1, %cst {dimension_numbers = #tpu.dot_dimension_numbers<[1], [0], [0], [1], [0, 0, 1, 1], [], []>} : vector<32x800xbf16>, vector<800x128xbf16>, vector<32x128xf32> -> vector<32x128xf32>
    %c0_3 = arith.constant 0 : index
    %c0_4 = arith.constant 0 : index
    %3 = vector.load %arg3[%c0_3, %c0_4] : memref<1x128xf32, #tpu.memory_space<vmem>>, vector<1x128xf32>
    %4 = vector.broadcast %3 : vector<1x128xf32> to vector<32x128xf32>
    %5 = arith.addf %2, %4 : vector<32x128xf32>
    %cst_5 = arith.constant 0.000000e+00 : f32
    %6 = vector.broadcast %cst_5 : f32 to vector<32x128xf32>
    %7 = arith.maximumf %5, %6 : vector<32x128xf32>
    %8 = arith.truncf %7 : vector<32x128xf32> to vector<32x128xbf16>
    %c0_6 = arith.constant 0 : index
    %c0_7 = arith.constant 0 : index
    %9 = vector.load %arg4[%c0_6, %c0_7] : memref<32x128xbf16, #tpu.memory_space<vmem>>, vector<32x128xbf16>
    tpu.vector_store %arg4[%c0_6, %c0_7], %8 {strides = array<i32>} : memref<32x128xbf16, #tpu.memory_space<vmem>>, vector<32x128xbf16>,
    return
  }
  func.func @transform_0(%arg0: i32) -> (i32, i32) {
    %c0_i32 = arith.constant 0 : i32
    %c0_i32_0 = arith.constant 0 : i32
    return %arg0, %c0_i32 : i32, i32
  }
  func.func @transform_1(%arg0: i32) -> (i32, i32) {
    %c0_i32 = arith.constant 0 : i32
    %c0_i32_0 = arith.constant 0 : i32
    %c0_i32_1 = arith.constant 0 : i32
    return %c0_i32, %c0_i32_0 : i32, i32
  }
  func.func @transform_2(%arg0: i32) -> (i32, i32) {
    %c0_i32 = arith.constant 0 : i32
    %c0_i32_0 = arith.constant 0 : i32
    %c0_i32_1 = arith.constant 0 : i32
    return %c0_i32, %c0_i32_0 : i32, i32
  }
  func.func @transform_3(%arg0: i32) -> (i32, i32) {
    %c0_i32 = arith.constant 0 : i32
    %c0_i32_0 = arith.constant 0 : i32
    return %arg0, %c0_i32 : i32, i32
  }
}

module attributes {stable_mosaic.version = 11 : i64} {
  func.func @_conv_pool_kernel(%arg0: i32, %arg1: i32, %arg2: memref<1x4x1600xbf16, #tpu.memory_space<vmem>>, %arg3: memref<1600x128xbf16, #tpu.memory_space<vmem>>, %arg4: memref<1x128xf32, #tpu.memory_space<vmem>>, %arg5: memref<1x1x128xf32, #tpu.memory_space<vmem>>) attributes {dimension_semantics = [#tpu.dimension_semantics<parallel>, #tpu.dimension_semantics<arbitrary>], iteration_bounds = array<i64: 2, 1>, scalar_prefetch = 0 : i64, scratch_operands = 0 : i64, tpu.core_type = #tpu.core_type<tc>, window_params = [{transform_indices = @transform_0, window_bounds = array<i64: 1, 4, 1600>}, {pipeline_mode = #tpu.pipeline_mode<synchronous>, transform_indices = @transform_1, window_bounds = array<i64: 1600, 128>}, {pipeline_mode = #tpu.pipeline_mode<synchronous>, transform_indices = @transform_2, window_bounds = array<i64: 1, 128>}, {transform_indices = @transform_3, window_bounds = array<i64: 1, 1, 128>}]} {
    %c0_i32 = arith.constant 0 : i32
    %0 = arith.cmpi eq, %arg1, %c0_i32 : i32
    %1 = arith.extui %0 : i1 to i32
    %c0_i32_0 = arith.constant 0 : i32
    %2 = arith.cmpi ne, %1, %c0_i32_0 : i32
    scf.if %2 {
      %cst_16 = arith.constant 0.000000e+00 : f32
      %20 = vector.broadcast %cst_16 : f32 to vector<1x1x128xf32>
      %c0_17 = arith.constant 0 : index
      %c0_18 = arith.constant 0 : index
      %c0_19 = arith.constant 0 : index
      %21 = vector.load %arg5[%c0_17, %c0_18, %c0_19] : memref<1x1x128xf32, #tpu.memory_space<vmem>>, vector<1x1x128xf32>
      tpu.vector_store %arg5[%c0_17, %c0_18, %c0_19], %20 {strides = array<i32>} : memref<1x1x128xf32, #tpu.memory_space<vmem>>, vector<1x1x128xf32>,
    } else {
    }
    %c0 = arith.constant 0 : index
    %c0_1 = arith.constant 0 : index
    %c0_2 = arith.constant 0 : index
    %3 = vector.load %arg2[%c0, %c0_1, %c0_2] : memref<1x4x1600xbf16, #tpu.memory_space<vmem>>, vector<1x4x1600xbf16>
    %4 = vector.shape_cast %3 : vector<1x4x1600xbf16> to vector<4x1600xbf16>
    %c0_3 = arith.constant 0 : index
    %c0_4 = arith.constant 0 : index
    %5 = vector.load %arg3[%c0_3, %c0_4] : memref<1600x128xbf16, #tpu.memory_space<vmem>>, vector<1600x128xbf16>
    %cst = arith.constant dense<0.000000e+00> : vector<4x128xf32>
    %6 = tpu.matmul %4, %5, %cst {dimension_numbers = #tpu.dot_dimension_numbers<[1], [0], [0], [1], [0, 0, 1, 1], [], []>} : vector<4x1600xbf16>, vector<1600x128xbf16>, vector<4x128xf32> -> vector<4x128xf32>
    %c0_5 = arith.constant 0 : index
    %c0_6 = arith.constant 0 : index
    %7 = vector.load %arg4[%c0_5, %c0_6] : memref<1x128xf32, #tpu.memory_space<vmem>>, vector<1x128xf32>
    %8 = vector.broadcast %7 : vector<1x128xf32> to vector<4x128xf32>
    %9 = arith.addf %6, %8 : vector<4x128xf32>
    %cst_7 = arith.constant 0.000000e+00 : f32
    %10 = vector.broadcast %cst_7 : f32 to vector<4x128xf32>
    %11 = arith.maximumf %9, %10 : vector<4x128xf32>
    %cst_8 = arith.constant dense<0.000000e+00> : vector<128xf32>
    %12 = vector.multi_reduction <add>, %11, %cst_8 [0] : vector<4x128xf32> to vector<128xf32>
    %13 = vector.shape_cast %12 : vector<128xf32> to vector<1x128xf32>
    %cst_9 = arith.constant 2.500000e-01 : f32
    %14 = vector.broadcast %cst_9 : f32 to vector<1x128xf32>
    %15 = arith.mulf %13, %14 : vector<1x128xf32>
    %c0_10 = arith.constant 0 : index
    %c0_11 = arith.constant 0 : index
    %c0_12 = arith.constant 0 : index
    %16 = vector.load %arg5[%c0_10, %c0_11, %c0_12] : memref<1x1x128xf32, #tpu.memory_space<vmem>>, vector<1x1x128xf32>
    %17 = vector.shape_cast %15 : vector<1x128xf32> to vector<1x1x128xf32>
    %18 = arith.addf %16, %17 : vector<1x1x128xf32>
    %c0_13 = arith.constant 0 : index
    %c0_14 = arith.constant 0 : index
    %c0_15 = arith.constant 0 : index
    %19 = vector.load %arg5[%c0_13, %c0_14, %c0_15] : memref<1x1x128xf32, #tpu.memory_space<vmem>>, vector<1x1x128xf32>
    tpu.vector_store %arg5[%c0_13, %c0_14, %c0_15], %18 {strides = array<i32>} : memref<1x1x128xf32, #tpu.memory_space<vmem>>, vector<1x1x128xf32>,
    return
  }
  func.func @transform_0(%arg0: i32, %arg1: i32) -> (i32, i32, i32) {
    %c0_i32 = arith.constant 0 : i32
    %c0_i32_0 = arith.constant 0 : i32
    return %arg0, %arg1, %c0_i32 : i32, i32, i32
  }
  func.func @transform_1(%arg0: i32, %arg1: i32) -> (i32, i32) {
    %c0_i32 = arith.constant 0 : i32
    %c0_i32_0 = arith.constant 0 : i32
    %c0_i32_1 = arith.constant 0 : i32
    return %c0_i32, %c0_i32_0 : i32, i32
  }
  func.func @transform_2(%arg0: i32, %arg1: i32) -> (i32, i32) {
    %c0_i32 = arith.constant 0 : i32
    %c0_i32_0 = arith.constant 0 : i32
    %c0_i32_1 = arith.constant 0 : i32
    return %c0_i32, %c0_i32_0 : i32, i32
  }
  func.func @transform_3(%arg0: i32, %arg1: i32) -> (i32, i32, i32) {
    %c0_i32 = arith.constant 0 : i32
    %c0_i32_0 = arith.constant 0 : i32
    %c0_i32_1 = arith.constant 0 : i32
    return %arg0, %c0_i32, %c0_i32_0 : i32, i32, i32
  }
}

</mosaic_0001>

<bundles_post_ra>
// kernel: conv3block_forward.2
= control target key start
LH: loop header
LB: loop body
LE: loop exit
PB: predicated region body
PF: predicated region fallthrough
CT: control target
= control target key end

     0   :  { %vm508_vm0 = vcmask 261120   ;;  %s1212_s1 = inlined_call_operand.vmem [shape: bf16[800,128], index: 1, kind: input, shape index: {}]   ;;  %s1213_s0 = inlined_call_operand.vmem [shape: bf16[32,800], index: 0, kind: input, shape index: {}]   ;;  %s1214_s2 = inlined_call_operand.vmem [shape: f32[1,128], index: 2, kind: input, shape index: {}]   ;;  %s1215_s3 = inlined_call_operand.vmem [shape: bf16[32,128], index: 3, kind: output, shape index: {}]  }
   0x1   :  { %v921_v0 = vld [vmem:[%s1212_s1 + $0x40] sm:$0xff]   ;;  %v925_v4 = vld [vmem:[%s1212_s1 + $0x48] sm:$0xff]   ;;  %v929_v8 = vld [vmem:[%s1212_s1 + $0x50] sm:$0xff]  }
   0x2   :  { %v922_v1 = vld [vmem:[%s1212_s1] sm:$0xff]   ;;  %825 = vmatprep.subr.bf16.mxu0 %v921_v0  ;;  %v926_v5 = vld [vmem:[%s1212_s1 + $0x8] sm:$0xff]   ;;  %v930_v9 = vld [vmem:[%s1212_s1 + $0x10] sm:$0xff]  }
   0x3   :  { %v923_v2 = vld [vmem:[%s1212_s1 + $0xc0] sm:$0xff]   ;;  %826 = vmatpush3.bf16.msra.mxu0 %v922_v1  ;;  %v927_v6 = vld [vmem:[%s1212_s1 + $0xc8] sm:$0xff]   ;;  %v931_v10 = vld [vmem:[%s1212_s1 + $0xd0] sm:$0xff]  }
   0x4   :  { %v924_v3 = vld [vmem:[%s1212_s1 + $0x80] sm:$0xff]   ;;  %853 = vmatprep.subr.bf16.mxu1 %v923_v2  ;;  %827 = vmatprep.subr.bf16.mxu0 %v925_v4  ;;  %v928_v7 = vld [vmem:[%s1212_s1 + $0x88] sm:$0xff]   ;;  %v932_v11 = vld [vmem:[%s1212_s1 + $0x90] sm:$0xff]  }
   0x5   :  { %854 = vmatpush3.bf16.msra.mxu1 %v924_v3  ;;  %v933_v12 = vld [vmem:[%s1212_s1 + $0x58] sm:$0xff]   ;;  %v937_v16 = vld [vmem:[%s1212_s1 + $0x60] sm:$0xff]   ;;  %v941_v20 = vld [vmem:[%s1212_s1 + $0x68] sm:$0xff]  }
   0x6   :  { %855 = vmatprep.subr.bf16.mxu1 %v927_v6  ;;  %v934_v13 = vld [vmem:[%s1212_s1 + $0x18] sm:$0xff]   ;;  %v938_v17 = vld [vmem:[%s1212_s1 + $0x20] sm:$0xff]   ;;  %v942_v21 = vld [vmem:[%s1212_s1 + $0x28] sm:$0xff]  }
   0x7   :  { %828 = vmatpush3.bf16.msra.mxu0 %v926_v5  ;;  %v935_v14 = vld [vmem:[%s1212_s1 + $0xd8] sm:$0xff]   ;;  %v939_v18 = vld [vmem:[%s1212_s1 + $0xe0] sm:$0xff]   ;;  %v943_v22 = vld [vmem:[%s1212_s1 + $0xe8] sm:$0xff]  }
   0x8   :  { %829 = vmatprep.subr.bf16.mxu0 %v929_v8  ;;  %v936_v15 = vld [vmem:[%s1212_s1 + $0x98] sm:$0xff]   ;;  %v940_v19 = vld [vmem:[%s1212_s1 + $0xa0] sm:$0xff]   ;;  %v944_v23 = vld [vmem:[%s1212_s1 + $0xa8] sm:$0xff]  }
   0x9   :  { %856 = vmatpush3.bf16.msra.mxu1 %v928_v7  ;;  %v945_v24 = vld [vmem:[%s1212_s1 + $0x70] sm:$0xff]   ;;  %v949_v28 = vld [vmem:[%s1212_s1 + $0x78] sm:$0xff]   ;;  %v954_v32 = vld [vmem:[%s1213_s0 + $0x4] ss:$28 sps:$4 sm:$0xff]  }
   0xa   :  { %857 = vmatprep.subr.bf16.mxu1 %v931_v10  ;;  %v946_v25 = vld [vmem:[%s1212_s1 + $0x30] sm:$0xff]   ;;  %v950_v29 = vld [vmem:[%s1212_s1 + $0x38] sm:$0xff]   ;;  %547 = vmatprep.mubr.bf16.mxu0 %v954_v32  ;;  %v956_v34 = vld [vmem:[%s1212_s1 + $0x140] sm:$0xff]  }
   0xb   :  { %830 = vmatpush3.bf16.msra.mxu0 %v930_v9  ;;  %v947_v26 = vld [vmem:[%s1212_s1 + $0xf0] sm:$0xff]   ;;  %v951_v30 = vld [vmem:[%s1212_s1 + $0xf8] sm:$0xff]   ;;  %v957_v35 = vld [vmem:[%s1213_s0 + $0x8] ss:$28 sps:$4 sm:$0xff]  }
   0xc   :  { %831 = vmatprep.subr.bf16.mxu0 %v933_v12  ;;  %v948_v27 = vld [vmem:[%s1212_s1 + $0xb0] sm:$0xff]   ;;  %v952_v31 = vld [vmem:[%s1213_s0] ss:$28 sps:$4 sm:$0xff]   ;;  %v959_v36 = vld [vmem:[%s1213_s0 + $0xc] ss:$28 sps:$4 sm:$0xff]  }
   0xd   :  { %858 = vmatpush3.bf16.msra.mxu1 %v932_v11  ;;  %v955_v33 = vld [vmem:[%s1212_s1 + $0xb8] sm:$0xff]   ;;  %v960_v37 = vld [vmem:[%s1212_s1 + $0x100] sm:$0xff]   ;;  %596 = vmatprep.mubr.bf16.mxu1 %v959_v36  ;;  %v961_v38 = vld [vmem:[%s1212_s1 + $0x148] sm:$0xff]  }
   0xe   :  { %859 = vmatprep.subr.bf16.mxu1 %v935_v14  ;;  %v962_v39 = vld [vmem:[%s1212_s1 + $0x108] sm:$0xff]   ;;  %v963_v40 = vld [vmem:[%s1212_s1 + $0x150] sm:$0xff]   ;;  %v965_v42 = vld [vmem:[%s1212_s1 + $0x158] sm:$0xff]  }
   0xf   :  { %832 = vmatpush3.bf16.msra.mxu0 %v934_v13  ;;  %v964_v41 = vld [vmem:[%s1212_s1 + $0x110] sm:$0xff]   ;;  %v969_v43 = vld [vmem:[%s1213_s0 + $0x3c] ss:$28 sps:$4 sm:$0xff]   ;;  %v967_v46 = vld [vmem:[%s1212_s1 + $0x160] sm:$0xff]  }
  0x10   :  { %833 = vmatprep.subr.bf16.mxu0 %v937_v16  ;;  %v966_v44 = vld [vmem:[%s1212_s1 + $0x118] sm:$0xff]   ;;  %v974_v47 = vld [vmem:[%s1213_s0 + $0x44] ss:$28 sps:$4 sm:$0xff]   ;;  %v971_v50 = vld [vmem:[%s1212_s1 + $0x168] sm:$0xff]  }
  0x11   :  { %860 = vmatpush3.bf16.msra.mxu1 %v936_v15  ;;  %v972_v45 = vld [vmem:[%s1213_s0 + $0x38] ss:$28 sps:$4 sm:$0xff]   ;;  %v976_v48 = vld [vmem:[%s1213_s0 + $0x40] ss:$28 sps:$4 sm:$0xff]   ;;  %v973_v52 = vld [vmem:[%s1212_s1 + $0x128] sm:$0xff]  }
  0x12   :  { %861 = vmatprep.subr.bf16.mxu1 %v939_v18  ;;  %v968_v49 = vld [vmem:[%s1212_s1 + $0x120] sm:$0xff]   ;;  %v977_v53 = vld [vmem:[%s1212_s1 + $0x170] sm:$0xff]   ;;  %v985_v56 = vld [vmem:[%s1212_s1 + $0x188] sm:$0xff]  }
  0x13   :  { %834 = vmatpush3.bf16.msra.mxu0 %v938_v17  ;;  %v979_v51 = vld [vmem:[%s1212_s1 + $0x180] sm:$0xff]   ;;  %v984_v54 = vld [vmem:[%s1213_s0 + $0x14] ss:$28 sps:$4 sm:$0xff]   ;;  %v980_v59 = vld [vmem:[%s1212_s1 + $0x178] sm:$0xff]  }
  0x14   :  { %835 = vmatprep.subr.bf16.mxu0 %v941_v20  ;;  %v978_v55 = vld [vmem:[%s1212_s1 + $0x130] sm:$0xff]   ;;  %v981_v60 = vld [vmem:[%s1212_s1 + $0x138] sm:$0xff]   ;;  %v988_v62 = vld [vmem:[%s1213_s0 + $0x4c] ss:$28 sps:$4 sm:$0xff]  }
  0x15   :  { %862 = vmatpush3.bf16.msra.mxu1 %v940_v19  ;;  %v986_v57 = vld [vmem:[%s1213_s0 + $0x18] ss:$28 sps:$4 sm:$0xff]   ;;  %v987_v58 = vld [vmem:[%s1213_s0 + $0x50] ss:$28 sps:$4 sm:$0xff]   ;;  %v990_v63 = vld [vmem:[%s1213_s0 + $0x48] ss:$28 sps:$4 sm:$0xff]  }
  0x16   :  { %863 = vmatprep.subr.bf16.mxu1 %v943_v22  ;;  %v982_v61 = vld [vmem:[%s1213_s0 + $0x10] ss:$28 sps:$4 sm:$0xff]   ;;  %v739_v1 = vld [vmem:[%s1214_s2] ss:$0 sm:$0xff] }
  0x17   :  { %836 = vmatpush3.bf16.msra.mxu0 %v942_v21 }
  0x18   :  { %837 = vmatprep.subr.bf16.mxu0 %v945_v24 }
  0x19   :  { %864 = vmatpush3.bf16.msra.mxu1 %v944_v23 }
  0x1a   :  { %865 = vmatprep.subr.bf16.mxu1 %v947_v26 }
  0x1b   :  { %838 = vmatpush3.bf16.msra.mxu0 %v946_v25 }
  0x1c   :  { %839 = vmatprep.subr.bf16.mxu0 %v949_v28 }
  0x1d   :  { %866 = vmatpush3.bf16.msra.mxu1 %v948_v27 }
  0x1e   :  { %867 = vmatprep.subr.bf16.mxu1 %v951_v30 }
  0x1f   :  { %840 = vmatpush3.bf16.msra.mxu0 %v950_v29 }
  0x20   :  { %881 = vmatprep.subr.bf16.mxu0 %v956_v34 }
  0x21   :  { %868 = vmatpush3.bf16.msra.mxu1 %v955_v33 }
  0x22   :  { %548 = vmatmul.mubr.bf16.vlgmr.msra.gmra.mrb[0].mxu0 %v952_v31  ;;  %913 = vmatprep.subr.bf16.mxu1 %v979_v51 }
  0x23   :  { %882 = vmatpush3.bf16.msra.mxu0 %v960_v37  ;;  %555 = vmatprep.mubr.bf16.mxu0 %v969_v43 }
  0x24   :  { %597 = vmatmul.mubr.bf16.vlgmr.msra.gmra.mrb[0].mxu1 %v957_v35  ;;  %883 = vmatprep.subr.bf16.mxu0 %v961_v38 }
  0x25   :  { %604 = vmatprep.mubr.bf16.mxu1 %v974_v47  ;;  %914 = vmatpush3.bf16.msra.mxu1 %v979_v51 }
  0x26   :  { %915 = vmatprep.subr.bf16.mxu1 %v985_v56 }
  0x27   :  { %884 = vmatpush3.bf16.msra.mxu0 %v962_v39 }
  0x28   :  { %885 = vmatprep.subr.bf16.mxu0 %v963_v40 }
  0x29   :  { %916 = vmatpush3.bf16.msra.mxu1 %v985_v56 }
  0x2a   :  { %556 = vmatmul.mubr.bf16.gmra.mrb[4].mxu0 %v972_v45 }
  0x2b   :  { %886 = vmatpush3.bf16.msra.mxu0 %v964_v41  ;;  %645 = vmatprep.mubr.bf16.mxu0 %v984_v54 }
  0x2c   :  { %887 = vmatprep.subr.bf16.mxu0 %v965_v42  ;;  %605 = vmatmul.mubr.bf16.gmra.mrb[4].mxu1 %v976_v48 }
  0x2d   :  { %917 = vmatprep.mubr.msk.bf16.mxu1 %vm508_vm0, %v986_v57 }
  0x2f   :  { %888 = vmatpush3.bf16.msra.mxu0 %v966_v44 }
  0x30   :  { %889 = vmatprep.subr.bf16.mxu0 %v967_v46 }
  0x33   :  { %890 = vmatpush3.bf16.msra.mxu0 %v968_v49 }
  0x34   :  { %891 = vmatprep.subr.bf16.mxu0 %v971_v50  ;;  %918 = vmatmul.mubr.msk.bf16.vlgmr.msra.gmra.mrb[8].mxu1 %vm508_vm0, %v987_v58 }
  0x37   :  { %892 = vmatpush3.bf16.msra.mxu0 %v973_v52 }
  0x38   :  { %893 = vmatprep.subr.bf16.mxu0 %v977_v53 }
  0x3b   :  { %894 = vmatpush3.bf16.msra.mxu0 %v978_v55 }
  0x3c   :  { %895 = vmatprep.subr.bf16.mxu0 %v980_v59 }
  0x3f   :  { %896 = vmatpush3.bf16.msra.mxu0 %v981_v60 }
  0x42   :  { %646 = vmatmul.mubr.bf16.vlgmr.msra.gmra.mrb[8].mxu0 %v982_v61 }
  0x43   :  { %653 = vmatprep.mubr.bf16.mxu0 %v988_v62 }
  0x4a   :  { %654 = vmatmul.mubr.bf16.gmra.mrb[12].mxu0 %v990_v63 }
  0xf5   :  { %v841_v0 = vpop.f32.mrb[0].mxu0 }
  0xf6   :  { %v842_v2 = vpop.f32.mrb[1].mxu0 }
  0xf7   :  { %v843_v3 = vadd.f32 %v842_v2, %v841_v0  ;;  %v844_v4 = vpop.f32.mrb[2].mxu0  ;;  %v869_v5 = vpop.f32.mrb[0].mxu1 }
  0xf8   :  { %v845_v6 = vpop.f32.mrb[3].mxu0  ;;  %v870_v9 = vpop.f32.mrb[1].mxu1 }
  0xf9   :  { %v550_v7 = vadd.f32 %v843_v3, %v739_v1  ;;  %v846_v8 = vadd.f32 %v845_v6, %v844_v4  ;;  %v871_v10 = vadd.f32 %v870_v9, %v869_v5  ;;  %v872_v11 = vpop.f32.mrb[2].mxu1 }
  0xfa   :  { %v873_v13 = vpop.f32.mrb[3].mxu1 }
  0xfb   :  { %v553_v12 = vadd.f32 %v846_v8, %v739_v1  ;;  %v599_v14 = vadd.f32 %v871_v10, %v550_v7  ;;  %v874_v15 = vadd.f32 %v873_v13, %v872_v11 }
  0xfd   :  { %v602_v16 = vadd.f32 %v874_v15, %v553_v12  ;;  %v847_v17 = vpop.f32.mrb[4].mxu0 }
  0xfe   :  { %v848_v18 = vpop.f32.mrb[5].mxu0 }
  0xff   :  { %v849_v19 = vadd.f32 %v848_v18, %v847_v17  ;;  %v850_v20 = vpop.f32.mrb[6].mxu0  ;;  %v875_v21 = vpop.f32.mrb[4].mxu1 }
 0x100   :  { %v851_v22 = vpop.f32.mrb[7].mxu0  ;;  %v876_v25 = vpop.f32.mrb[5].mxu1 }
 0x101   :  { %v558_v23 = vadd.f32 %v849_v19, %v739_v1  ;;  %v852_v24 = vadd.f32 %v851_v22, %v850_v20  ;;  %v877_v26 = vadd.f32 %v876_v25, %v875_v21  ;;  %v878_v27 = vpop.f32.mrb[6].mxu1 }
 0x102   :  { %v879_v29 = vpop.f32.mrb[7].mxu1 }
 0x103   :  { %v561_v28 = vadd.f32 %v852_v24, %v739_v1  ;;  %v607_v30 = vadd.f32 %v877_v26, %v558_v23  ;;  %v880_v31 = vadd.f32 %v879_v29, %v878_v27 }
 0x105   :  { %v610_v32 = vadd.f32 %v880_v31, %v561_v28 }
 0x107   :  { %v919_v33 = vpop.f32.mrb[8].mxu1 }
 0x108   :  { %v696_v34 = vpop.f32.mrb[9].mxu1 }
 0x109   :  { %v920_v35 = vpop.f32.mrb[10].mxu1 }
 0x10a   :  { %v699_v36 = vpop.f32.mrb[11].mxu1 }
 0x115   :  { %v897_v37 = vpop.f32.mrb[8].mxu0 }
 0x116   :  { %v898_v38 = vpop.f32.mrb[9].mxu0 }
 0x117   :  { %v899_v39 = vadd.f32 %v898_v38, %v897_v37  ;;  %v900_v40 = vpop.f32.mrb[10].mxu0 }
 0x118   :  { %v901_v41 = vpop.f32.mrb[11].mxu0 }
 0x119   :  { %v902_v42 = vadd.f32 %v901_v41, %v900_v40  ;;  %v648_v43 = vadd.f32 %v899_v39, %v599_v14 }
 0x11b   :  { %v697_v44 = vadd.f32 %v696_v34, %v648_v43  ;;  %v651_v45 = vadd.f32 %v902_v42, %v602_v16 }
 0x11d   :  { %v700_v46 = vadd.f32 %v699_v36, %v651_v45  ;;  %v903_v47 = vpop.f32.mrb[12].mxu0  ;;  %v711_v49 = vmax.f32 %v697_v44, 0.0 }
 0x11e   :  { %v904_v48 = vpop.f32.mrb[13].mxu0 }
 0x11f   :  { %v712_v50 = vmax.f32 %v700_v46, 0.0  ;;  %v905_v51 = vadd.f32 %v904_v48, %v903_v47  ;;  %v906_v52 = vpop.f32.mrb[14].mxu0 }
 0x120   :  { %v907_v53 = vpop.f32.mrb[15].mxu0 }
 0x121   :  { %v817_v54 = vpack.c.bf16 %v712_v50, %v711_v49  ;;  %v656_v55 = vadd.f32 %v905_v51, %v607_v30  ;;  %v908_v56 = vadd.f32 %v907_v53, %v906_v52 }
 0x123   :  { %818 = vst [vmem:[%s1215_s3] sm:$0xff] %v817_v54   ;;  %v705_v57 = vadd.f32 %v919_v33, %v656_v55  ;;  %v659_v58 = vadd.f32 %v908_v56, %v610_v32 }
 0x125   :  { %v708_v59 = vadd.f32 %v920_v35, %v659_v58  ;;  %v713_v60 = vmax.f32 %v705_v57, 0.0 }
 0x127   :  { %v714_v61 = vmax.f32 %v708_v59, 0.0 }
 0x129   :  { %v822_v62 = vpack.c.bf16 %v714_v61, %v713_v60 }
 0x12b   :  { %824 = vst [vmem:[%s1215_s3 + $0x8] sm:$0xff] %v822_v62  }

// kernel: conv3block_forward.3
= control target key start
LH: loop header
LB: loop body
LE: loop exit
PB: predicated region body
PF: predicated region fallthrough
CT: control target
= control target key end

     0   :  { %8 = vsyncpa [#allocation3], 0  ;;  %s2433_s0 = inlined_call_operand.vmem [shape: bf16[2,4,1600], index: 0, kind: input, shape index: {}]   ;;  %s2434_s1 = inlined_call_operand.vmem [shape: bf16[1600,128], index: 1, kind: input, shape index: {}]   ;;  %s2435_s2 = inlined_call_operand.vmem [shape: f32[1,128], index: 2, kind: input, shape index: {}]   ;;  %s2436_s3 = inlined_call_operand.hbm [shape: f32[2,1,128], index: 3, kind: output, shape index: {}]  }
   0x1   :  { %10 = vsyncpa [#allocation3 + $0x1], 0  ;;  %s1994_s12 = smov 0   ;;  %s1996_s13 = smov 0  }
   0x2   :  { %s1998_s14 = smov 0   ;;  %s2000_s15 = smov 0  }
   0x3   :  { %s2002_s16 = smov 0   ;;  %s2004_s17 = smov 0  }
   0x4 LB: > { %s1467_s18 = sadd.s32 4294967295, %s1968_s17   ;;  %s1468_s19 = sadd.s32 4294967294, %s1968_s17   ;;  %s1968_s17 = sphi %s2004_s17, %s16_s17   ;;  %s1964_s16 = sphi %s2002_s16, %s2443_s16   ;;  %s1960_s15 = sphi %s2000_s15, %s2442_s15   ;;  %s1956_s14 = sphi %s1998_s14, %s2441_s14   ;;  %s1952_s13 = sphi %s1996_s13, %s2440_s13   ;;  %s1948_s12 = sphi %s1994_s12, %s2439_s12  }
   0x5   : > { %s28_s20 = sadd.s32 1, %s1964_s16  ;;  %s105_s21 = sadd.s32 1, %s1956_s14 }
   0x6   : > { %p30_p0 = scmp.ge.s32.totalorder %s28_s20, 2  ;;  %p115_p1 = scmp.ne.s32.totalorder %s1956_s14, %s1952_s13 }
   0x7   : > { %p116_p2 = scmp.eq.s32.totalorder %s1467_s18, 1  ;;  %p121_p3 = scmp.ne.s32.totalorder %s1952_s13, %s1948_s12 }
   0x8   : > { %s2445_s20 = smov (%p30_p0, %s28_s20), 0  ;;  %p122_p5 = scmp.eq.s32.totalorder %s1468_s19, 1 }
   0x9   : > { %p2034_p4 = por %p116_p2, %p115_p1  ;;  %s102_s23 = ssub.s32 %s1964_s16, %s2445_s20 }
   0xa   : > { %p1471_p6 = scmp.ge.s32.totalorder %s1968_s17, 1  ;;  %p103_p7 = scmp.eq.s32.totalorder %s102_s23, 0 }
   0xb   : > { %p2041_p8 = por %p122_p5, %p121_p3  ;;  %p158_p9 = scmp.lt.s32.totalorder %s1968_s17, 3 }
   0xc   : > { %s2047_s25 = scalar_select %p103_p7, %s1956_s14, %s105_s21  }
   0xd   : > { %p159_p10 = pnand %p1471_p6, %p158_p9 }
   0xe   : > { %v1787_v0 = vld [vmem:[%s2434_s1 + $0x40] sm:$0xff] (!%p159_p10)   ;;  %v1791_v4 = vld [vmem:[%s2434_s1 + $0x48] sm:$0xff] (!%p159_p10)   ;;  %v1795_v8 = vld [vmem:[%s2434_s1 + $0x50] sm:$0xff] (!%p159_p10)   ;;  %p185_p11 = scmp.lt.s32.totalorder (!%p159_p10), %s1960_s15, 1  ;;  %v419_v27 = vlaneseq (!%p159_p10)  ;;  %v1970_v35 = vmov (!%p159_p10), 1983009808  }
   0xf   : > { %162 = sbr.rel (%p159_p10) target bundleno = 374 (0x176), region = 32  ;;  %v1788_v1 = vld [vmem:[%s2434_s1] sm:$0xff] (!%p159_p10)   ;;  %1579 = vmatprep.subr.bf16.mxu0 (!%p159_p10), %v1787_v0  ;;  %v1792_v5 = vld [vmem:[%s2434_s1 + $0x8] sm:$0xff] (!%p159_p10)   ;;  %v1796_v9 = vld [vmem:[%s2434_s1 + $0x10] sm:$0xff] (!%p159_p10)   ;;  %v417_v36 = vunpack.c.l.s4 (!%p159_p10), %v1970_v35  ;;  %vm1972_vm0 = vmmov (!%p159_p10), 0   ;;  %vm1085_vm1 = vcmask (!%p159_p10), 523264  }
  0x10   : > { %v1789_v2 = vld [vmem:[%s2434_s1 + $0xc0] sm:$0xff] (!%p159_p10)   ;;  %1580 = vmatpush3.bf16.msra.mxu0 (!%p159_p10), %v1788_v1  ;;  %v1793_v6 = vld [vmem:[%s2434_s1 + $0xc8] sm:$0xff] (!%p159_p10)   ;;  %v1797_v10 = vld [vmem:[%s2434_s1 + $0xd0] sm:$0xff] (!%p159_p10)   ;;  %v420_v32 = vshrl.u32 (!%p159_p10), %v419_v27, 7  ;;  %vm1370_vm2 = vcmask (!%p159_p10), 1043456  }
  0x11   : > { %v1790_v3 = vld [vmem:[%s2434_s1 + $0x80] sm:$0xff] (!%p159_p10)   ;;  %1601 = vmatprep.subr.bf16.mxu1 (!%p159_p10), %v1789_v2  ;;  %1581 = vmatprep.subr.bf16.mxu0 (!%p159_p10), %v1791_v4  ;;  %v1794_v7 = vld [vmem:[%s2434_s1 + $0x88] sm:$0xff] (!%p159_p10)   ;;  %v1798_v11 = vld [vmem:[%s2434_s1 + $0x90] sm:$0xff] (!%p159_p10)   ;;  %v418_v38 = vunpack.c.0.s8 (!%p159_p10), %v417_v36 }
  0x12   : > { %1602 = vmatpush3.bf16.msra.mxu1 (!%p159_p10), %v1790_v3  ;;  %v1799_v12 = vld [vmem:[%s2434_s1 + $0x58] sm:$0xff] (!%p159_p10)   ;;  %v1803_v16 = vld [vmem:[%s2434_s1 + $0x60] sm:$0xff] (!%p159_p10)   ;;  %v1807_v20 = vld [vmem:[%s2434_s1 + $0x68] sm:$0xff] (!%p159_p10)  }
  0x13   : > { %1603 = vmatprep.subr.bf16.mxu1 (!%p159_p10), %v1793_v6  ;;  %v1800_v13 = vld [vmem:[%s2434_s1 + $0x18] sm:$0xff] (!%p159_p10)   ;;  %v1804_v17 = vld [vmem:[%s2434_s1 + $0x20] sm:$0xff] (!%p159_p10)   ;;  %v1808_v21 = vld [vmem:[%s2434_s1 + $0x28] sm:$0xff] (!%p159_p10)   ;;  %v2159_v41 = vsub.s32 (!%p159_p10), %v418_v38, %v420_v32 }
  0x14   : > { %1582 = vmatpush3.bf16.msra.mxu0 (!%p159_p10), %v1792_v5  ;;  %v1801_v14 = vld [vmem:[%s2434_s1 + $0xd8] sm:$0xff] (!%p159_p10)   ;;  %v1805_v18 = vld [vmem:[%s2434_s1 + $0xe0] sm:$0xff] (!%p159_p10)   ;;  %v1809_v22 = vld [vmem:[%s2434_s1 + $0xe8] sm:$0xff] (!%p159_p10)  }
  0x15   : > { %1583 = vmatprep.subr.bf16.mxu0 (!%p159_p10), %v1795_v8  ;;  %v1802_v15 = vld [vmem:[%s2434_s1 + $0x98] sm:$0xff] (!%p159_p10)   ;;  %v1806_v19 = vld [vmem:[%s2434_s1 + $0xa0] sm:$0xff] (!%p159_p10)   ;;  %v1810_v23 = vld [vmem:[%s2434_s1 + $0xa8] sm:$0xff] (!%p159_p10)  }
  0x16   : > { %1604 = vmatpush3.bf16.msra.mxu1 %v1794_v7  ;;  %s186_s7 = scalar_select %p185_p11, %s1960_s15, 1  ;;  %v1811_v24 = vld [vmem:[%s2434_s1 + $0x70] sm:$0xff]   ;;  %v1815_v29 = vld [vmem:[%s2434_s1 + $0x78] sm:$0xff]   ;;  %v1819_v37 = vld [vmem:[%s2434_s1 + $0x140] sm:$0xff]  }
  0x17   : > { %1605 = vmatprep.subr.bf16.mxu1 %v1797_v10  ;;  %v1812_v25 = vld [vmem:[%s2434_s1 + $0x30] sm:$0xff]   ;;  %v1816_v30 = vld [vmem:[%s2434_s1 + $0x38] sm:$0xff]   ;;  %v1822_v40 = vld [vmem:[%s2434_s1 + $0x1c0] sm:$0xff]  }
  0x18   : > { %1584 = vmatpush3.bf16.msra.mxu0 %v1796_v9  ;;  %s1728_s26 = smul.u32 26, %s186_s7  ;;  %v1813_v26 = vld [vmem:[%s2434_s1 + $0xf0] sm:$0xff]   ;;  %v1817_v31 = vld [vmem:[%s2434_s1 + $0xf8] sm:$0xff]   ;;  %v1821_v44 = vld [vmem:[%s2434_s1 + $0x100] sm:$0xff]   ;;  %s183_s7 = sand.u32 1, %s1952_s13  }
  0x19   : > { %1585 = vmatprep.subr.bf16.mxu0 %v1799_v12  ;;  %v1814_v28 = vld [vmem:[%s2434_s1 + $0xb0] sm:$0xff]   ;;  %v1818_v34 = vld [vmem:[%s2434_s1 + $0xb8] sm:$0xff]   ;;  %v1823_v45 = vld [vmem:[%s2434_s1 + $0x180] sm:$0xff]   ;;  %s2371_s9 = scalar_lea.vmem [#allocation2], %s183_s7 }
  0x1a   : > { %1606 = vmatpush3.bf16.msra.mxu1 %v1798_v11  ;;  %s2141_s10 = scalar_lea.vmem %s2433_s0, %s1728_s26  ;;  %v1824_v48 = vld [vmem:[%s2434_s1 + $0x148] sm:$0xff]   ;;  %v1828_v52 = vld [vmem:[%s2434_s1 + $0x150] sm:$0xff]   ;;  %v1832_v56 = vld [vmem:[%s2434_s1 + $0x158] sm:$0xff]   ;;  %s1395_s19 = sshll.u32 %s2371_s9, 4  ;;  %s2385_s19 = int_to_ptr.vmem [resolvable:$true] %s1395_s19 }
  0x1b   : > { %1607 = vmatprep.subr.bf16.mxu1 %v1801_v14  ;;  %v200_v33 = vld [vmem:[%s2141_s10] sm:$0xff]  ;;  %v1826_v49 = vld [vmem:[%s2434_s1 + $0x1c8] sm:$0xff]   ;;  %v1830_v53 = vld [vmem:[%s2434_s1 + $0x1d0] sm:$0xff]   ;;  %s1383_s26 = scalar_lea.sflag [#allocation3], %s183_s7  ;;  %s1890_s28 = scalar_lea.vmem %s2385_s19, 16 }
  0x1c   : > { %1586 = vmatpush3.bf16.msra.mxu0 %v1800_v13  ;;  %v415_v39 = vcombine.high %v200_v33, %v200_v33  ;;  %v422_v42 = vrot.slane %v200_v33, %v2159_v41  ;;  %v1825_v50 = vld [vmem:[%s2434_s1 + $0x108] sm:$0xff]   ;;  %v1829_v54 = vld [vmem:[%s2434_s1 + $0x110] sm:$0xff]   ;;  %v1834_v57 = vld [vmem:[%s2434_s1 + $0x1d8] sm:$0xff]   ;;  %p1891_p12 = scmp.ne.s32.totalorder %s2385_s19, %s1890_s28 }
  0x1d   : > { %1587 = vmatprep.subr.bf16.mxu0 %v1803_v16  ;;  %v1827_v51 = vld [vmem:[%s2434_s1 + $0x188] sm:$0xff]   ;;  %v1831_v55 = vld [vmem:[%s2434_s1 + $0x190] sm:$0xff]   ;;  %v1833_v58 = vld [vmem:[%s2434_s1 + $0x118] sm:$0xff]  }
  0x1e   : > { %1608 = vmatpush3.bf16.msra.mxu1 %v1802_v15  ;;  %v429_v43 = vrot.slane %v415_v39, %v2159_v41  ;;  %v430_v46 = vcombine.high %v422_v42, %v422_v42  ;;  %v1835_v59 = vld [vmem:[%s2434_s1 + $0x198] sm:$0xff]   ;;  %v1836_v60 = vld [vmem:[%s2434_s1 + $0x160] sm:$0xff]   ;;  %v1840_v0 = vld [vmem:[%s2434_s1 + $0x168] sm:$0xff]   ;;  %p1892_p13 = pnand %p1891_p12, %p2034_p4 }
  0x1f   : > { %1609 = vmatprep.subr.bf16.mxu1 %v1805_v18  ;;  %v1838_v61 = vld [vmem:[%s2434_s1 + $0x1e0] sm:$0xff]   ;;  %v1842_v1 = vld [vmem:[%s2434_s1 + $0x1e8] sm:$0xff]   ;;  %v1844_v4 = vld [vmem:[%s2434_s1 + $0x170] sm:$0xff]  }
  0x20   : > { %1588 = vmatpush3.bf16.msra.mxu0 %v1804_v17  ;;  %v431_v47 = vcombine.high %v429_v43, %v429_v43  ;;  %1121 = vmatprep.mubr.bf16.mxu0 %v430_v46  ;;  %v1837_v62 = vld [vmem:[%s2434_s1 + $0x120] sm:$0xff]   ;;  %v1841_v2 = vld [vmem:[%s2434_s1 + $0x128] sm:$0xff]   ;;  %v1846_v5 = vld [vmem:[%s2434_s1 + $0x1f0] sm:$0xff]   ;;  %p1893_p0 = pneg %p1892_p13 }
  0x21   : > { %1589 = vmatprep.subr.bf16.mxu0 %v1807_v20  ;;  %v1839_v63 = vld [vmem:[%s2434_s1 + $0x1a0] sm:$0xff]   ;;  %v1843_v3 = vld [vmem:[%s2434_s1 + $0x1a8] sm:$0xff]   ;;  %v1845_v6 = vld [vmem:[%s2434_s1 + $0x130] sm:$0xff]  }
  0x22   : > { %1610 = vmatpush3.bf16.msra.mxu1 %v1806_v19  ;;  %1161 = vmatprep.mubr.bf16.mxu1 %v431_v47  ;;  %v1847_v7 = vld [vmem:[%s2434_s1 + $0x1b0] sm:$0xff]   ;;  %v201_v8 = vld [vmem:[%s2141_s10 + $0x8] sm:$0xff]  ;;  %v1848_v9 = vld [vmem:[%s2434_s1 + $0x178] sm:$0xff]  }
  0x23   : > { %1611 = vmatprep.subr.bf16.mxu1 %v1809_v22  ;;  %v439_v10 = vrot.slane %v201_v8, %v2159_v41  ;;  %v432_v11 = vcombine.high %v201_v8, %v201_v8  ;;  %v1850_v12 = vld [vmem:[%s2434_s1 + $0x1f8] sm:$0xff]   ;;  %v1852_v17 = vld [vmem:[%s2434_s1 + $0x240] sm:$0xff]   ;;  %v1857_v22 = vld [vmem:[%s2434_s1 + $0x248] sm:$0xff]  }
  0x24   : > { %1590 = vmatpush3.bf16.msra.mxu0 %v1808_v21  ;;  %v1849_v13 = vld [vmem:[%s2434_s1 + $0x138] sm:$0xff]   ;;  %v1855_v19 = vld [vmem:[%s2434_s1 + $0x2c0] sm:$0xff]   ;;  %v1863_v27 = vld [vmem:[%s2434_s1 + $0x2d0] sm:$0xff]  }
  0x25   : > { %1591 = vmatprep.subr.bf16.mxu0 %v1811_v24  ;;  %v447_v14 = vcombine.high %v439_v10, %v439_v10  ;;  %v446_v15 = vrot.slane %v432_v11, %v2159_v41  ;;  %v1851_v16 = vld [vmem:[%s2434_s1 + $0x1b8] sm:$0xff]   ;;  %v1854_v20 = vld [vmem:[%s2434_s1 + $0x200] sm:$0xff]   ;;  %v1858_v24 = vld [vmem:[%s2434_s1 + $0x208] sm:$0xff]  }
  0x26   : > { %1612 = vmatpush3.bf16.msra.mxu1 %v1810_v23  ;;  %v1856_v21 = vld [vmem:[%s2434_s1 + $0x280] sm:$0xff]   ;;  %v1859_v23 = vld [vmem:[%s2434_s1 + $0x2c8] sm:$0xff]   ;;  %v1866_v32 = vld [vmem:[%s2434_s1 + $0x218] sm:$0xff]  }
  0x27   : > { %1613 = vmatprep.subr.bf16.mxu1 %v1813_v26  ;;  %v448_v18 = vcombine.high %v446_v15, %v446_v15  ;;  %v1861_v26 = vld [vmem:[%s2434_s1 + $0x250] sm:$0xff]   ;;  %v1868_v33 = vld [vmem:[%s2434_s1 + $0x298] sm:$0xff]   ;;  %v1871_v35 = vld [vmem:[%s2434_s1 + $0x2e0] sm:$0xff]  }
  0x28   : > { %1592 = vmatpush3.bf16.msra.mxu0 %v1812_v25  ;;  %v1860_v25 = vld [vmem:[%s2434_s1 + $0x288] sm:$0xff]   ;;  %v1870_v36 = vld [vmem:[%s2434_s1 + $0x220] sm:$0xff]   ;;  %v1880_v46 = vld [vmem:[%s2434_s1 + $0x2b0] sm:$0xff]  }
  0x29   : > { %1593 = vmatprep.subr.bf16.mxu0 %v1815_v29  ;;  %v1864_v29 = vld [vmem:[%s2434_s1 + $0x290] sm:$0xff]   ;;  %v1873_v38 = vld [vmem:[%s2434_s1 + $0x268] sm:$0xff]  }
  0x2a   : > { %1614 = vmatpush3.bf16.msra.mxu1 %v1814_v28  ;;  %v1862_v28 = vld [vmem:[%s2434_s1 + $0x210] sm:$0xff]   ;;  %v1875_v39 = vld [vmem:[%s2434_s1 + $0x2e8] sm:$0xff]  }
  0x2b   : > { %1615 = vmatprep.subr.bf16.mxu1 %v1817_v31  ;;  %v1867_v31 = vld [vmem:[%s2434_s1 + $0x2d8] sm:$0xff]   ;;  %v202_v47 = vld [vmem:[%s2141_s10 + $0x10] sm:$0xff] }
  0x2c   : > { %1594 = vmatpush3.bf16.msra.mxu0 %v1816_v30  ;;  %v1865_v30 = vld [vmem:[%s2434_s1 + $0x258] sm:$0xff]  }
  0x2d   : > { %1623 = vmatprep.subr.bf16.mxu0 %v1819_v37  ;;  %v1872_v37 = vld [vmem:[%s2434_s1 + $0x2a0] sm:$0xff]  }
  0x2e   : > { %1616 = vmatpush3.bf16.msra.mxu1 %v1818_v34  ;;  %v1869_v34 = vld [vmem:[%s2434_s1 + $0x260] sm:$0xff]  }
  0x2f   : > { %1645 = vmatprep.subr.bf16.mxu1 %v1822_v40  ;;  %1122 = vmatmul.mubr.bf16.vlgmr.msra.gmra.mrb[0].mxu0 %v422_v42  ;;  %v1874_v40 = vld [vmem:[%s2434_s1 + $0x228] sm:$0xff]  }
  0x30   : > { %1624 = vmatpush3.bf16.msra.mxu0 %v1821_v44  ;;  %1201 = vmatprep.mubr.bf16.mxu0 %v447_v14  ;;  %v1876_v42 = vld [vmem:[%s2434_s1 + $0x2a8] sm:$0xff]   ;;  %v1879_v44 = vld [vmem:[%s2434_s1 + $0x2f0] sm:$0xff]  }
  0x31   : > { %1162 = vmatmul.mubr.bf16.vlgmr.msra.gmra.mrb[0].mxu1 %v429_v43  ;;  %1625 = vmatprep.subr.bf16.mxu0 %v1824_v48  ;;  %v1877_v43 = vld [vmem:[%s2434_s1 + $0x270] sm:$0xff]   ;;  %v1881_v48 = vld [vmem:[%s2434_s1 + $0x278] sm:$0xff]  }
  0x32   : > { %1646 = vmatpush3.bf16.msra.mxu1 %v1823_v45  ;;  %1241 = vmatprep.mubr.bf16.mxu1 %v448_v18  ;;  %v1878_v45 = vld [vmem:[%s2434_s1 + $0x230] sm:$0xff]  }
  0x33   : > { %1647 = vmatprep.subr.bf16.mxu1 %v1826_v49  ;;  %v456_v49 = vrot.slane %v202_v47, %v2159_v41 }
  0x34   : > { %1626 = vmatpush3.bf16.msra.mxu0 %v1825_v50  ;;  %v449_v50 = vcombine.high %v202_v47, %v202_v47 }
  0x35   : > { %1627 = vmatprep.subr.bf16.mxu0 %v1828_v52  ;;  %v464_v52 = vcombine.high %v456_v49, %v456_v49 }
  0x36   : > { %1648 = vmatpush3.bf16.msra.mxu1 %v1827_v51  ;;  %v1883_v51 = vld [vmem:[%s2434_s1 + $0x2f8] sm:$0xff]  }
  0x37   : > { %1649 = vmatprep.subr.bf16.mxu1 %v1830_v53  ;;  %v463_v53 = vrot.slane %v449_v50, %v2159_v41  ;;  %v1886_v41 = vld [vmem:[%s2434_s1 + $0x300] sm:$0xff]  }
  0x38   : > { %1628 = vmatpush3.bf16.msra.mxu0 %v1829_v54  ;;  %v1882_v54 = vld [vmem:[%s2434_s1 + $0x238] sm:$0xff]  }
  0x39   : > { %1629 = vmatprep.subr.bf16.mxu0 %v1832_v56  ;;  %v465_v56 = vcombine.high %v463_v53, %v463_v53 }
  0x3a   : > { %1650 = vmatpush3.bf16.msra.mxu1 %v1831_v55  ;;  %v1884_v55 = vld [vmem:[%s2434_s1 + $0x2b8] sm:$0xff]  }
  0x3b   : > { %1651 = vmatprep.subr.bf16.mxu1 %v1834_v57  ;;  %v1971_v57 = vmov 0.0  }
  0x3c   : > { %1630 = vmatpush3.bf16.msra.mxu0 %v1833_v58  ;;  %v1887_v58 = vld [vmem:[%s2434_s1 + $0x308] sm:$0xff]   ;;  %199 = vst [vmem:[%s2371_s9] sm:$0x1] %v1971_v57 }
  0x3d   : > { %1631 = vmatprep.subr.bf16.mxu0 %v1836_v60  ;;  %v1889_v60 = vld [vmem:[%s2434_s1 + $0x318] sm:$0xff]  }
  0x3e   : > { %1652 = vmatpush3.bf16.msra.mxu1 %v1835_v59  ;;  %v1888_v59 = vld [vmem:[%s2434_s1 + $0x310] sm:$0xff]  }
  0x3f   : > { %1653 = vmatprep.subr.bf16.mxu1 %v1838_v61  ;;  %v1474_v61 = vld.sshfl [vmem:[%s2141_s10 + $0x18] sm:$0x3 pattern:$0x76325410]  ;;  %s1576_s10 = sshll.u32 %s1960_s15, 4  ;;  %s1973_s15 = smov [#allocation2]  }
  0x40   : > { %1632 = vmatpush3.bf16.msra.mxu0 %v1837_v62  ;;  %s2383_s27 = scalar_lea.hbm %s2436_s3, %s1576_s10  ;;  %s1894_s29 = sshll.u32 %s1973_s15, 4  ;;  %s1895_s29 = int_to_ptr.vmem [resolvable:$false] %s1894_s29 }
  0x41   : > { %1633 = vmatprep.subr.bf16.mxu0 %v1840_v0  ;;  %v1473_v0 = vld [vmem:[%s2435_s2] ss:$0 sm:$0xff]  ;;  %s1896_s30 = scalar_lea.vmem %s1895_s29, 32  ;;  %p1897_p1 = scmp.lt.s32.totalorder %s2385_s19, %s1895_s29 }
  0x42   : > { %1654 = vmatpush3.bf16.msra.mxu1 %v1839_v63  ;;  %p1898_p2 = scmp.lt.s32.totalorder %s1896_s30, %s1890_s28 }
  0x43   : > { %1655 = vmatprep.subr.bf16.mxu1 %v1842_v1 }
  0x44   : > { %1634 = vmatpush3.bf16.msra.mxu0 %v1841_v2  ;;  %p1899_p3 = por %p1898_p2, %p1897_p1 }
  0x45   : > { %1635 = vmatprep.subr.bf16.mxu0 %v1844_v4 }
  0x46   : > { %1656 = vmatpush3.bf16.msra.mxu1 %v1843_v3  ;;  %p1900_p5 = pnand %p1899_p3, %p1893_p0 }
  0x47   : > { %1657 = vmatprep.subr.bf16.mxu1 %v1846_v5 }
  0x48   : > { %1636 = vmatpush3.bf16.msra.mxu0 %v1845_v6 }
  0x49   : > { %1637 = vmatprep.subr.bf16.mxu0 %v1848_v9 }
  0x4a   : > { %1658 = vmatpush3.bf16.msra.mxu1 %v1847_v7 }
  0x4b   : > { %1659 = vmatprep.subr.bf16.mxu1 %v1850_v12 }
  0x4c   : > { %1638 = vmatpush3.bf16.msra.mxu0 %v1849_v13 }
  0x4d   : > { %1667 = vmatprep.subr.bf16.mxu0 %v1852_v17 }
  0x4e   : > { %1660 = vmatpush3.bf16.msra.mxu1 %v1851_v16 }
  0x4f   : > { %1689 = vmatprep.subr.bf16.mxu1 %v1855_v19  ;;  %1202 = vmatmul.mubr.bf16.vlgmr.msra.gmra.mrb[4].mxu0 %v439_v10 }
  0x50   : > { %1668 = vmatpush3.bf16.msra.mxu0 %v1854_v20  ;;  %1281 = vmatprep.mubr.bf16.mxu0 %v464_v52 }
  0x51   : > { %1242 = vmatmul.mubr.bf16.vlgmr.msra.gmra.mrb[4].mxu1 %v446_v15  ;;  %1669 = vmatprep.subr.bf16.mxu0 %v1857_v22 }
  0x52   : > { %1690 = vmatpush3.bf16.msra.mxu1 %v1856_v21  ;;  %1321 = vmatprep.mubr.bf16.mxu1 %v465_v56 }
  0x53   : > { %1691 = vmatprep.subr.bf16.mxu1 %v1859_v23 }
  0x54   : > { %1670 = vmatpush3.bf16.msra.mxu0 %v1858_v24 }
  0x55   : > { %1671 = vmatprep.subr.bf16.mxu0 %v1861_v26 }
  0x56   : > { %1692 = vmatpush3.bf16.msra.mxu1 %v1860_v25 }
  0x57   : > { %1693 = vmatprep.subr.bf16.mxu1 %v1863_v27 }
  0x58   : > { %1672 = vmatpush3.bf16.msra.mxu0 %v1862_v28 }
  0x59   : > { %1673 = vmatprep.subr.bf16.mxu0 %v1865_v30 }
  0x5a   : > { %1694 = vmatpush3.bf16.msra.mxu1 %v1864_v29 }
  0x5b   : > { %1695 = vmatprep.subr.bf16.mxu1 %v1867_v31 }
  0x5c   : > { %1674 = vmatpush3.bf16.msra.mxu0 %v1866_v32 }
  0x5d   : > { %1675 = vmatprep.subr.bf16.mxu0 %v1869_v34 }
  0x5e   : > { %1696 = vmatpush3.bf16.msra.mxu1 %v1868_v33 }
  0x5f   : > { %1697 = vmatprep.subr.bf16.mxu1 %v1871_v35 }
  0x60   : > { %1676 = vmatpush3.bf16.msra.mxu0 %v1870_v36 }
  0x61   : > { %1677 = vmatprep.subr.bf16.mxu0 %v1873_v38 }
  0x62   : > { %1698 = vmatpush3.bf16.msra.mxu1 %v1872_v37 }
  0x63   : > { %1699 = vmatprep.subr.bf16.mxu1 %v1875_v39 }
  0x64   : > { %1678 = vmatpush3.bf16.msra.mxu0 %v1874_v40 }
  0x65   : > { %1679 = vmatprep.subr.bf16.mxu0 %v1877_v43 }
  0x66   : > { %1700 = vmatpush3.bf16.msra.mxu1 %v1876_v42 }
  0x67   : > { %1701 = vmatprep.subr.bf16.mxu1 %v1879_v44 }
  0x68   : > { %1680 = vmatpush3.bf16.msra.mxu0 %v1878_v45 }
  0x69   : > { %1681 = vmatprep.subr.bf16.mxu0 %v1881_v48 }
  0x6a   : > { %1702 = vmatpush3.bf16.msra.mxu1 %v1880_v46 }
  0x6b   : > { %1703 = vmatprep.subr.bf16.mxu1 %v1883_v51 }
  0x6c   : > { %1682 = vmatpush3.bf16.msra.mxu0 %v1882_v54 }
  0x6d   : > { %1716 = vmatprep.subr.bf16.mxu0 %v1971_v57 }
  0x6e   : > { %1704 = vmatpush3.bf16.msra.mxu1 %v1884_v55 }
  0x6f   : > { %1282 = vmatmul.mubr.bf16.vlgmr.msra.gmra.mrb[8].mxu0 %v456_v49  ;;  %v1379_v49 = vld [vmem:[%s2371_s9] sm:$0x1] }
  0x70   : > { %1717 = vmatpush3.bf16.msra.mxu0 %v1886_v41  ;;  %1724 = vmatprep.mubr.msk.bf16.mxu0 %vm1972_vm0, %v1971_v57 }
  0x71   : > { %1322 = vmatmul.mubr.bf16.vlgmr.msra.gmra.mrb[8].mxu1 %v463_v53  ;;  %1718 = vmatprep.subr.bf16.mxu0 %v1971_v57 }
  0x74   : > { %1719 = vmatpush3.bf16.msra.mxu0 %v1887_v58 }
  0x75   : > { %1720 = vmatprep.subr.bf16.mxu0 %v1971_v57 }
  0x78   : > { %1721 = vmatpush3.bf16.msra.mxu0 %v1888_v59 }
  0x79   : > { %1722 = vmatprep.subr.bf16.mxu0 %v1971_v57 }
  0x7c   : > { %1723 = vmatpush3.bf16.msra.mxu0 %v1889_v60 }
  0x7f   : > { %1725 = vmatmul.mubr.msk.bf16.vlgmr.msra.gmra.mrb[12].mxu0 %vm1085_vm1, %v1474_v61 }
 0x102   : > { %v1595_v62 = vpop.f32.mrb[0].mxu0 }
 0x103   : > { %v1596_v1 = vpop.f32.mrb[1].mxu0 }
 0x104   : > { %v1617_v63 = vpop.f32.mrb[0].mxu1  ;;  %v1597_v3 = vadd.f32 %v1596_v1, %v1595_v62  ;;  %v1598_v4 = vpop.f32.mrb[2].mxu0 }
 0x105   : > { %v1618_v2 = vpop.f32.mrb[1].mxu1  ;;  %v1599_v7 = vpop.f32.mrb[3].mxu0 }
 0x106   : > { %v1619_v5 = vadd.f32 %v1618_v2, %v1617_v63  ;;  %v1620_v6 = vpop.f32.mrb[2].mxu1  ;;  %v1124_v9 = vadd.f32 %v1597_v3, %v1473_v0 }
 0x107   : > { %v1621_v8 = vpop.f32.mrb[3].mxu1 }
 0x108   : > { %v1164_v10 = vadd.f32 %v1619_v5, %v1124_v9 }
 0x122   : > { %v1639_v11 = vpop.f32.mrb[4].mxu0 }
 0x123   : > { %v1640_v13 = vpop.f32.mrb[5].mxu0 }
 0x124   : > { %v1661_v12 = vpop.f32.mrb[4].mxu1  ;;  %v1641_v15 = vadd.f32 %v1640_v13, %v1639_v11  ;;  %v1642_v16 = vpop.f32.mrb[6].mxu0 }
 0x125   : > { %v1662_v14 = vpop.f32.mrb[5].mxu1  ;;  %v1643_v19 = vpop.f32.mrb[7].mxu0 }
 0x126   : > { %v1663_v17 = vadd.f32 %v1662_v14, %v1661_v12  ;;  %v1664_v18 = vpop.f32.mrb[6].mxu1  ;;  %v1204_v21 = vadd.f32 %v1641_v15, %v1164_v10 }
 0x127   : > { %v1665_v20 = vpop.f32.mrb[7].mxu1 }
 0x128   : > { %v1244_v22 = vadd.f32 %v1663_v17, %v1204_v21 }
 0x142   : > { %v1683_v23 = vpop.f32.mrb[8].mxu0 }
 0x143   : > { %v1684_v25 = vpop.f32.mrb[9].mxu0 }
 0x144   : > { %v1705_v24 = vpop.f32.mrb[8].mxu1  ;;  %v1685_v27 = vadd.f32 %v1684_v25, %v1683_v23  ;;  %v1686_v28 = vpop.f32.mrb[10].mxu0 }
 0x145   : > { %v1706_v26 = vpop.f32.mrb[9].mxu1  ;;  %v1687_v31 = vpop.f32.mrb[11].mxu0 }
 0x146   : > { %v1707_v29 = vadd.f32 %v1706_v26, %v1705_v24  ;;  %v1708_v30 = vpop.f32.mrb[10].mxu1  ;;  %v1284_v33 = vadd.f32 %v1685_v27, %v1244_v22 }
 0x147   : > { %v1709_v32 = vpop.f32.mrb[11].mxu1 }
 0x148   : > { %v1324_v34 = vadd.f32 %v1707_v29, %v1284_v33 }
 0x152   : > { %v1363_v35 = vpop.f32.mrb[12].mxu0 }
 0x153   : > { %v1364_v36 = vadd.f32 %v1363_v35, %v1324_v34  ;;  %v1726_v37 = vpop.f32.mrb[13].mxu0 }
 0x154   : > { %v1366_v38 = vpop.f32.mrb[14].mxu0 }
 0x155   : > { %v1369_v39 = vmax.f32 %v1364_v36, 0.0  ;;  %v1727_v40 = vpop.f32.mrb[15].mxu0 }
 0x157   : > { %v1371_v42 = vsel %vm1370_vm2, %v1369_v39, 0.0 }
 0x158   : > { %v1372_v43 = vrot.slane %v1371_v42, 4 }
 0x15a   : > { %v1373_v44 = vadd.f32 %v1372_v43, %v1371_v42 }
 0x15c   : > { %v1374_v45 = vrot.slane %v1373_v44, 2 }
 0x15e   : > { %v1375_v46 = vadd.f32 %v1374_v45, %v1373_v44 }
 0x160   : > { %v1376_v47 = vrot.slane %v1375_v46, 1 }
 0x162   : > { %v1377_v48 = vadd.f32 %v1376_v47, %v1375_v46 }
 0x164   : > { %v1378_v50 = vmul.f32 0.25, %v1377_v48 }
 0x166   : > { %v1380_v51 = vadd.f32 %v1379_v49, %v1378_v50 }
 0x168   : > { %1381 = vst [vmem:[%s2371_s9] sm:$0x1] %v1380_v51 }
 0x169   : > { %1903 = shalt.err (!%p1900_p5)
}
 0x16a   : > { %s1904_s4 = scalar_lea.hbm %s2383_s27, 16  ;;  %s1908_s8 = scalar_lea.hbm %s2436_s3, 32 }
 0x16b   : > { %p1905_p6 = scmp.ne.s32.totalorder %s2383_s27, %s1904_s4  ;;  %p1909_p10 = scmp.lt.u32.totalorder %s2383_s27, %s2436_s3 }
 0x16c   : > { %p1910_p11 = scmp.lt.u32.totalorder %s1908_s8, %s1904_s4  ;;  %p1912_p13 = scmp.lt.u32.totalorder %s1904_s4, %s2383_s27 }
 0x16d   : > { %p1906_p7 = pnand %p1905_p6, %p2034_p4 }
 0x16e   : > { %p1911_p12 = por %p1910_p11, %p1909_p10 }
 0x16f   : > { %p1907_p9 = pneg %p1906_p7 }
 0x170   : > { %p1913_p0 = por %p1912_p13, %p1911_p12 }
 0x172   : > { %p1914_p1 = pnand %p1913_p0, %p1907_p9 }
 0x174   : > { %1917 = shalt.err (!%p1914_p1)
}
 0x175   : > { %1729 = dma.vmem_to_hbm [thread:$0]  (%p2034_p4), %s2385_s19, 16, %s2383_s27, %s1383_s26  }
 0x176 PF: > { %p1735_p2 = scmp.ge.s32.totalorder %s1968_s17, 2  ;;  %s1407_s11 = sand.u32 1, %s1948_s12  }
 0x177   : > { %s1408_s18 = scalar_lea.sflag [#allocation3], %s1407_s11 }
 0x178   : > { %p1732_p3 = pnand %p1735_p2, %p2041_p8 }
 0x17a   : > { %1943 = dma.done.wait (!%p1732_p3), %s1408_s18, 16  }
 0x17b   : > { %1945 = vsyncadd (!%p1732_p3), %s1408_s18, 4294967280  ;;  %s16_s17 = sadd.s32 1, %s1968_s17   ;;  %s2439_s12 = smov %s1952_s13 }
 0x17c   : > { %p13_p5 = scmp.ge.s32.totalorder %s16_s17, 4   ;;  %s2440_s13 = smov %s1956_s14 }
 0x17d   : > { %s2441_s14 = smov %s2047_s25  ;;  %s2442_s15 = smov %s1964_s16 }
 0x17e   : > { %s2443_s16 = smov %s2445_s20  ;;  %15 = sbr.rel (!%p13_p5) target bundleno = 4 (0x4), region = 71 }
 0x185   :  { %1412 = vsyncpa [#allocation3], 1 }
 0x186   :  { %1414 = vsyncpa [#allocation3 + $0x1], 1 }

</bundles_post_ra>
